<compile_context>
chip_gen: v5e
topology: v5e:2x2
jax: 0.10.0
libtpu: 0.0.40
codegen_flags: <defaults>
</compile_context>

<pallas_src>
import numpy as np
import jax
import jax.numpy as jnp
from jax import lax
from jax.experimental import pallas as pl
from jax.experimental.pallas import tpu as pltpu

# --- module "parameters" (deterministic, from __init__(max_update=10, _lambda=2)) ---
_LAMBDA = 2
_tmp = np.power(1.0 / 10.0, 1.0 / _LAMBDA)   # (1/max_update)^(1/lambda)
_tmp = 1.0 / _tmp
_MAX_UPDATE = float(1.0 / (_tmp - 1.0))      # ~0.4625
_SCALE = 1.0 + _MAX_UPDATE

_LANES = 128

# Path thresholds / tile sizes (rows are 128-lane rows of f32).
_FAST_MAX_ROWS = 2048                         # <=1 MiB/input: single resident block
_MED_TILE_ROWS = 2048                         # 1 MiB input tile in the medium path
_MED_MAX_TILES = 24                           # |d| slab cap: 24 MiB VMEM (fits v7x)
_MED_MAX_ROWS = _MED_TILE_ROWS * _MED_MAX_TILES   # ~6.3M elems -> single HBM pass
_STREAM_TILE_ROWS = 8192                      # 4 MiB input tile in the streaming path


def _rate_times_d(d, inv_dm):
    # rate * d with _lambda == 2:  d / (1 - d/diff_max)^2.
    # pl.reciprocal (exact) moves the divide off the VALU slot.
    base = 1.0 - d * inv_dm
    r = pl.reciprocal(base)
    return r * r * d


# ----------------------------------------------------------------------------
# Fast path: whole (rows,128) problem resident in VMEM, one kernel, one pass.
# ----------------------------------------------------------------------------
def _fast_kernel(tailmax_ref, p_ref, t_ref, sum_ref, dmax_ref):
    d = jnp.abs(p_ref[...] - t_ref[...])
    gmax = jnp.maximum(jnp.max(d), tailmax_ref[0])   # include the <128-elem JAX tail
    diff_max = _SCALE * gmax
    dmax_ref[...] = diff_max.reshape(1, 1)
    sum_ref[...] = jnp.sum(_rate_times_d(d, 1.0 / diff_max)).reshape(1, 1)


def _fast_path(p2, t2, tail_max):
    rows = p2.shape[0]
    full = pl.BlockSpec((rows, _LANES), lambda i: (0, 0))
    scalar_out = pl.BlockSpec((1, 1), lambda i: (0, 0))
    total, dmax = pl.pallas_call(
        _fast_kernel,
        out_shape=(jax.ShapeDtypeStruct((1, 1), jnp.float32),
                   jax.ShapeDtypeStruct((1, 1), jnp.float32)),
        grid=(1,),
        in_specs=[pl.BlockSpec(memory_space=pltpu.MemorySpace.SMEM), full, full],
        out_specs=(scalar_out, scalar_out),
        compiler_params=pltpu.CompilerParams(
            dimension_semantics=("arbitrary",),
            vmem_limit_bytes=32 << 20),
    )(tail_max, p2, t2)
    return total[0, 0], dmax[0, 0]


# ----------------------------------------------------------------------------
# Medium path: ONE pass over HBM.  Tiles of |pred-target| are parked in a VMEM
# slab while a vreg-wide max accumulates; the sum phase reads the slab on the
# final grid step (halves HBM traffic vs. the 2-pass streaming path).
# ----------------------------------------------------------------------------
def _make_medium_kernel(rows, n_tiles):
    tr = _MED_TILE_ROWS
    need_mask = (rows % tr) != 0

    def kernel(tailmax_ref, p_ref, t_ref, sum_ref, dmax_ref, slab_ref, mx_ref):
        i = pl.program_id(0)

        @pl.when(i == 0)
        def _():
            mx_ref[...] = jnp.zeros_like(mx_ref)     # |d| >= 0, so 0 is a valid identity

        d = jnp.abs(p_ref[...] - t_ref[...])

        def write_and_max(x):
            slab_ref[i] = x
            mx_ref[...] = jnp.maximum(
                mx_ref[...], jnp.max(x.reshape(tr // 8, 8, _LANES), axis=0))

        if need_mask:
            # Only the last tile overlaps the ragged edge; gate the mask work there.
            @pl.when(i == n_tiles - 1)
            def _():
                ridx = i * tr + lax.broadcasted_iota(jnp.int32, d.shape, 0)
                write_and_max(jnp.where(ridx < rows, d, 0.0))

            @pl.when(i != n_tiles - 1)
            def _():
                write_and_max(d)
        else:
            write_and_max(d)

        @pl.when(i == n_tiles - 1)
        def _():
            gmax = jnp.maximum(jnp.max(mx_ref[...]), tailmax_ref[0])
            diff_max = _SCALE * gmax
            dmax_ref[...] = diff_max.reshape(1, 1)
            inv_dm = 1.0 / diff_max

            def body(j, acc):
                dj = slab_ref[j]                      # resident in VMEM, no HBM read
                term = _rate_times_d(dj, inv_dm)
                return acc + jnp.sum(term.reshape(tr // 8, 8, _LANES), axis=0)

            acc = lax.fori_loop(0, n_tiles, body,
                                jnp.zeros((8, _LANES), jnp.float32))
            sum_ref[...] = jnp.sum(acc).reshape(1, 1)

    return kernel


def _medium_path(p2, t2, tail_max, rows):
    tr = _MED_TILE_ROWS
    n_tiles = pl.cdiv(rows, tr)
    tile = pl.BlockSpec((tr, _LANES), lambda i: (i, 0))
    scalar_out = pl.BlockSpec((1, 1), lambda i: (0, 0))
    total, dmax = pl.pallas_call(
        _make_medium_kernel(rows, n_tiles),
        out_shape=(jax.ShapeDtypeStruct((1, 1), jnp.float32),
                   jax.ShapeDtypeStruct((1, 1), jnp.float32)),
        grid=(n_tiles,),
        in_specs=[pl.BlockSpec(memory_space=pltpu.MemorySpace.SMEM), tile, tile],
        out_specs=(scalar_out, scalar_out),
        scratch_shapes=[pltpu.VMEM((n_tiles, tr, _LANES), jnp.float32),  # |d| slab
                        pltpu.VMEM((8, _LANES), jnp.float32)],           # vreg max
        compiler_params=pltpu.CompilerParams(
            dimension_semantics=("arbitrary",),
            vmem_limit_bytes=44 << 20),
    )(tail_max, p2, t2)
    return total[0, 0], dmax[0, 0]


# ----------------------------------------------------------------------------
# Streaming path (very large inputs): two bandwidth-bound passes, large tiles,
# (8,128) vreg accumulators, unconditional 2-way core split.
# ----------------------------------------------------------------------------
def _make_stream_max_kernel(rows, tiles_per_core, first_masked, any_mask):
    tr = _STREAM_TILE_ROWS

    def tile_max(x):
        return jnp.max(x.reshape(tr // 8, 8, _LANES), axis=0)

    def kernel(p_ref, t_ref, out_ref, acc_ref):
        c = pl.program_id(0)
        i = pl.program_id(1)

        @pl.when(i == 0)
        def _():
            acc_ref[...] = jnp.zeros_like(acc_ref)

        d = jnp.abs(p_ref[...] - t_ref[...])
        g = c * tiles_per_core + i                    # global (unclamped) tile index

        if any_mask:
            @pl.when(g >= first_masked)
            def _():
                ridx = g * tr + lax.broadcasted_iota(jnp.int32, d.shape, 0)
                acc_ref[...] = jnp.maximum(
                    acc_ref[...], tile_max(jnp.where(ridx < rows, d, 0.0)))

            @pl.when(g < first_masked)
            def _():
                acc_ref[...] = jnp.maximum(acc_ref[...], tile_max(d))
        else:
            acc_ref[...] = jnp.maximum(acc_ref[...], tile_max(d))

        @pl.when(i == tiles_per_core - 1)
        def _():
            out_ref[...] = jnp.max(acc_ref[...]).reshape(1, 1)

    return kernel


def _make_stream_sum_kernel(rows, tiles_per_core, first_masked, any_mask):
    tr = _STREAM_TILE_ROWS

    def kernel(inv_ref, p_ref, t_ref, out_ref, acc_ref):
        c = pl.program_id(0)
        i = pl.program_id(1)

        @pl.when(i == 0)
        def _():
            acc_ref[...] = jnp.zeros_like(acc_ref)

        d = jnp.abs(p_ref[...] - t_ref[...])
        g = c * tiles_per_core + i
        inv_dm = inv_ref[0]                           # 1/diff_max, SMEM scalar

        def tile_sum(x):
            term = _rate_times_d(x, inv_dm)           # masked lanes: d=0 -> term=0
            return jnp.sum(term.reshape(tr // 8, 8, _LANES), axis=0)

        if any_mask:
            @pl.when(g >= first_masked)
            def _():
                ridx = g * tr + lax.broadcasted_iota(jnp.int32, d.shape, 0)
                acc_ref[...] += tile_sum(jnp.where(ridx < rows, d, 0.0))

            @pl.when(g < first_masked)
            def _():
                acc_ref[...] += tile_sum(d)
        else:
            acc_ref[...] += tile_sum(d)

        @pl.when(i == tiles_per_core - 1)
        def _():
            out_ref[...] = jnp.sum(acc_ref[...]).reshape(1, 1)

    return kernel


def _stream_path(p2, t2, tail_max, rows):
    tr = _STREAM_TILE_ROWS
    n_tiles = pl.cdiv(rows, tr)
    n_cores = 2 if n_tiles >= 2 else 1                # unconditional 2-TC split (v7x)
    tiles_per_core = pl.cdiv(n_tiles, n_cores)
    ragged = (rows % tr) != 0
    first_masked = (n_tiles - 1) if ragged else n_tiles
    any_mask = ragged or (n_cores * tiles_per_core > n_tiles)

    # Padded (fully out-of-range) tiles are clamped onto the last real tile;
    # the in-kernel row mask zeroes whatever data gets read there.
    def tile_idx(c, i):
        return (jnp.minimum(c * tiles_per_core + i, n_tiles - 1), 0)

    tile = pl.BlockSpec((tr, _LANES), tile_idx)
    part = pl.BlockSpec((1, 1), lambda c, i: (c, 0))
    grid = (n_cores, tiles_per_core)
    cparams = pltpu.CompilerParams(
        dimension_semantics=("parallel", "arbitrary"),
        vmem_limit_bytes=40 << 20)
    acc = pltpu.VMEM((8, _LANES), jnp.float32)

    # Pass 1: per-core partial max of |pred - target|.
    max_parts = pl.pallas_call(
        _make_stream_max_kernel(rows, tiles_per_core, first_masked, any_mask),
        out_shape=jax.ShapeDtypeStruct((n_cores, 1), jnp.float32),
        grid=grid, in_specs=[tile, tile], out_specs=part,
        scratch_shapes=[acc], compiler_params=cparams,
    )(p2, t2)

    # Tiny scalar combine in JAX; negligible vs. the huge inputs this path serves.
    gmax = jnp.maximum(jnp.max(max_parts), tail_max[0])
    diff_max = _SCALE * gmax
    inv_dm = (1.0 / diff_max).astype(jnp.float32).reshape(1)

    # Pass 2: per-core partial sum of rate * |pred - target|.
    sum_parts = pl.pallas_call(
        _make_stream_sum_kernel(rows, tiles_per_core, first_masked, any_mask),
        out_shape=jax.ShapeDtypeStruct((n_cores, 1), jnp.float32),
        grid=grid,
        in_specs=[pl.BlockSpec(memory_space=pltpu.MemorySpace.SMEM), tile, tile],
        out_specs=part,
        scratch_shapes=[acc], compiler_params=cparams,
    )(inv_dm, p2, t2)

    return jnp.sum(sum_parts), diff_max


# ----------------------------------------------------------------------------
# Public wrapper
# ----------------------------------------------------------------------------
def focal_loss_regression(pred, target, path=None):
    n = pred.size
    p = pred.reshape(-1).astype(jnp.float32)
    t = target.reshape(-1).astype(jnp.float32)

    n_tail = n % _LANES
    n_pref = n - n_tail

    if n_pref == 0:
        # < 128 elements: pad a single lane-row (padded zeros are inert for both
        # the max and the sum).
        pad = _LANES - n
        p_pref = jnp.concatenate([p, jnp.zeros((pad,), jnp.float32)])
        t_pref = jnp.concatenate([t, jnp.zeros((pad,), jnp.float32)])
        rows = 1
        d_tail = None
    else:
        rows = n_pref // _LANES
        if n_tail:
            # Run the kernels on the 128-aligned prefix; handle the <128-element
            # tail in plain JAX (no padded copy of the full inputs).
            p_pref, t_pref = p[:n_pref], t[:n_pref]
            d_tail = jnp.abs(p[n_pref:] - t[n_pref:])
        else:
            p_pref, t_pref = p, t
            d_tail = None

    tail_max = (jnp.max(d_tail).reshape(1).astype(jnp.float32)
                if d_tail is not None else jnp.zeros((1,), jnp.float32))

    p2 = p_pref.reshape(rows, _LANES)
    t2 = t_pref.reshape(rows, _LANES)

    if path is None:
        if rows <= _FAST_MAX_ROWS:
            path = "fast"
        elif rows <= _MED_MAX_ROWS:
            path = "medium"
        else:
            path = "stream"

    if path == "fast":
        total, diff_max = _fast_path(p2, t2, tail_max)
    elif path == "medium":
        total, diff_max = _medium_path(p2, t2, tail_max, rows)
    else:
        total, diff_max = _stream_path(p2, t2, tail_max, rows)

    if d_tail is not None:
        base = 1.0 - d_tail / diff_max
        total = total + jnp.sum(d_tail / (base * base))

    return total / jnp.float32(n)


def _reference(pred, target):
    """Pure-JAX reference mirroring the PyTorch forward."""
    diff_abs = jnp.abs(pred.astype(jnp.float32) - target.astype(jnp.float32))
    diff_max = _SCALE * jnp.max(diff_abs)
    rate = 1.0 / ((1.0 - 1.0 / diff_max * diff_abs) ** _LAMBDA)
    return jnp.mean(rate * diff_abs)


if __name__ == "__main__":
    key = jax.random.PRNGKey(0)
    ks = jax.random.split(key, 8)

    # 1) Small module-sized input -> fast (fully VMEM-resident) path.
    pred = jax.random.normal(ks[0], (2, 4, 16, 16), dtype=jnp.float32)
    target = jax.random.normal(ks[1], (2, 4, 16, 16), dtype=jnp.float32)
    loss = jax.block_until_ready(focal_loss_regression(pred, target))
    np.testing.assert_allclose(np.asarray(loss),
                               np.asarray(_reference(pred, target)),
                               rtol=1e-5, atol=1e-6)

    # 2) Non-lane-aligned input -> fast path + plain-JAX tail combine.
    pred_u = jax.random.normal(ks[2], (3, 5, 37), dtype=jnp.float32)
    target_u = jax.random.normal(ks[3], (3, 5, 37), dtype=jnp.float32)
    loss_u = jax.block_until_ready(focal_loss_regression(pred_u, target_u))
    np.testing.assert_allclose(np.asarray(loss_u),
                               np.asarray(_reference(pred_u, target_u)),
                               rtol=1e-5, atol=1e-6)

    # 3) Mid-size input -> single-HBM-pass medium path (ragged last tile).
    pred_m = jax.random.normal(ks[4], (2, 4, 540, 128), dtype=jnp.float32)
    target_m = jax.random.normal(ks[5], (2, 4, 540, 128), dtype=jnp.float32)
    loss_m = jax.block_until_ready(focal_loss_regression(pred_m, target_m))
    np.testing.assert_allclose(np.asarray(loss_m),
                               np.asarray(_reference(pred_m, target_m)),
                               rtol=1e-4, atol=1e-6)

    # 4) Larger input: auto (medium) and forced streaming (2-pass, 2-core grid,
    #    ragged + padded trailing tiles) must both match the reference.
    pred_l = jax.random.normal(ks[6], (2, 10000, 128), dtype=jnp.float32)
    target_l = jax.random.normal(ks[7], (2, 10000, 128), dtype=jnp.float32)
    ref_l = np.asarray(_reference(pred_l, target_l))
    loss_l = jax.block_until_ready(focal_loss_regression(pred_l, target_l))
    np.testing.assert_allclose(np.asarray(loss_l), ref_l, rtol=1e-4, atol=1e-6)
    loss_s = jax.block_until_ready(
        focal_loss_regression(pred_l, target_l, path="stream"))
    np.testing.assert_allclose(np.asarray(loss_s), ref_l, rtol=1e-4, atol=1e-6)

    print("KERNEL_OK")
</pallas_src>

<mosaic_0001>
module attributes {stable_mosaic.version = 11 : i64} {
  func.func @_fast_kernel(%arg0: i32, %arg1: memref<1xf32, #tpu.memory_space<smem>>, %arg2: memref<16x128xf32, #tpu.memory_space<vmem>>, %arg3: memref<16x128xf32, #tpu.memory_space<vmem>>, %arg4: memref<1x1xf32, #tpu.memory_space<vmem>>, %arg5: memref<1x1xf32, #tpu.memory_space<vmem>>) attributes {dimension_semantics = [#tpu.dimension_semantics<arbitrary>], iteration_bounds = array<i64: 1>, scalar_prefetch = 0 : i64, scratch_operands = 0 : i64, tpu.core_type = #tpu.core_type<tc>, window_params = [{transform_indices = @transform_0, window_bounds = array<i64: 1>}, {pipeline_mode = #tpu.pipeline_mode<synchronous>, transform_indices = @transform_1, window_bounds = array<i64: 16, 128>}, {pipeline_mode = #tpu.pipeline_mode<synchronous>, transform_indices = @transform_2, window_bounds = array<i64: 16, 128>}, {pipeline_mode = #tpu.pipeline_mode<synchronous>, transform_indices = @transform_3, window_bounds = array<i64: 1, 1>}, {pipeline_mode = #tpu.pipeline_mode<synchronous>, transform_indices = @transform_4, window_bounds = array<i64: 1, 1>}]} {
    %c0 = arith.constant 0 : index
    %c0_0 = arith.constant 0 : index
    %0 = vector.load %arg2[%c0, %c0_0] : memref<16x128xf32, #tpu.memory_space<vmem>>, vector<16x128xf32>
    %c0_1 = arith.constant 0 : index
    %c0_2 = arith.constant 0 : index
    %1 = vector.load %arg3[%c0_1, %c0_2] : memref<16x128xf32, #tpu.memory_space<vmem>>, vector<16x128xf32>
    %2 = arith.subf %0, %1 : vector<16x128xf32>
    %3 = math.absf %2 : vector<16x128xf32>
    %4 = vector.shape_cast %3 : vector<16x128xf32> to vector<1x16x128xf32>
    %cst = arith.constant dense<0xFF800000> : vector<1xf32>
    %5 = vector.multi_reduction <maximumf>, %4, %cst [1, 2] : vector<1x16x128xf32> to vector<1xf32>
    %6 = vector.shape_cast %5 : vector<1xf32> to vector<1x1x1xf32>
    %7 = vector.extract %6[0, 0, 0] : f32 from vector<1x1x1xf32>
    %c0_3 = arith.constant 0 : index
    %8 = memref.load %arg1[%c0_3] : memref<1xf32, #tpu.memory_space<smem>>
    %9 = arith.maximumf %7, %8 : f32
    %cst_4 = arith.constant 1.4624753 : f32
    %10 = arith.mulf %cst_4, %9 : f32
    %11 = vector.broadcast %10 : f32 to vector<1x1xf32>
    %c0_5 = arith.constant 0 : index
    %c0_6 = arith.constant 0 : index
    %12 = vector.load %arg5[%c0_5, %c0_6] : memref<1x1xf32, #tpu.memory_space<vmem>>, vector<1x1xf32>
    tpu.vector_store %arg5[%c0_5, %c0_6], %11 {strides = array<i32>} : memref<1x1xf32, #tpu.memory_space<vmem>>, vector<1x1xf32>,
    %cst_7 = arith.constant 1.000000e+00 : f32
    %13 = arith.divf %cst_7, %10 : f32
    %14 = vector.broadcast %13 : f32 to vector<16x128xf32>
    %15 = arith.mulf %3, %14 : vector<16x128xf32>
    %cst_8 = arith.constant 1.000000e+00 : f32
    %16 = vector.broadcast %cst_8 : f32 to vector<16x128xf32>
    %17 = arith.subf %16, %15 : vector<16x128xf32>
    %18 = tpu.reciprocal %17 : vector<16x128xf32> -> vector<16x128xf32>
    %19 = arith.mulf %18, %18 : vector<16x128xf32>
    %20 = arith.mulf %19, %3 : vector<16x128xf32>
    %21 = vector.shape_cast %20 : vector<16x128xf32> to vector<1x16x128xf32>
    %cst_9 = arith.constant dense<0.000000e+00> : vector<1xf32>
    %22 = vector.multi_reduction <add>, %21, %cst_9 [1, 2] : vector<1x16x128xf32> to vector<1xf32>
    %23 = vector.shape_cast %22 : vector<1xf32> to vector<1x1x1xf32>
    %24 = vector.extract %23[0, 0, 0] : f32 from vector<1x1x1xf32>
    %25 = vector.broadcast %24 : f32 to vector<1x1xf32>
    %c0_10 = arith.constant 0 : index
    %c0_11 = arith.constant 0 : index
    %26 = vector.load %arg4[%c0_10, %c0_11] : memref<1x1xf32, #tpu.memory_space<vmem>>, vector<1x1xf32>
    tpu.vector_store %arg4[%c0_10, %c0_11], %25 {strides = array<i32>} : memref<1x1xf32, #tpu.memory_space<vmem>>, vector<1x1xf32>,
    return
  }
  func.func @transform_0(%arg0: i32) -> i32 {
    %c0_i32 = arith.constant 0 : i32
    %c0_i32_0 = arith.constant 0 : i32
    return %c0_i32 : i32
  }
  func.func @transform_1(%arg0: i32) -> (i32, i32) {
    %c0_i32 = arith.constant 0 : i32
    %c0_i32_0 = arith.constant 0 : i32
    %c0_i32_1 = arith.constant 0 : i32
    return %c0_i32, %c0_i32_0 : i32, i32
  }
  func.func @transform_2(%arg0: i32) -> (i32, i32) {
    %c0_i32 = arith.constant 0 : i32
    %c0_i32_0 = arith.constant 0 : i32
    %c0_i32_1 = arith.constant 0 : i32
    return %c0_i32, %c0_i32_0 : i32, i32
  }
  func.func @transform_3(%arg0: i32) -> (i32, i32) {
    %c0_i32 = arith.constant 0 : i32
    %c0_i32_0 = arith.constant 0 : i32
    %c0_i32_1 = arith.constant 0 : i32
    return %c0_i32, %c0_i32_0 : i32, i32
  }
  func.func @transform_4(%arg0: i32) -> (i32, i32) {
    %c0_i32 = arith.constant 0 : i32
    %c0_i32_0 = arith.constant 0 : i32
    %c0_i32_1 = arith.constant 0 : i32
    return %c0_i32, %c0_i32_0 : i32, i32
  }
}

</mosaic_0001>

<bundles_post_ra>
// kernel: tpu_custom_call.1
= control target key start
LH: loop header
LB: loop body
LE: loop exit
PB: predicated region body
PF: predicated region fallthrough
CT: control target
= control target key end

     0   :  { %11 = vsyncpa [#allocation4], 0  ;;  %s354_s0 = inlined_call_operand.<no memory space> [shape: f32[1], index: 0, kind: input, shape index: {}]   ;;  %s355_s1 = inlined_call_operand.hbm [shape: f32[16,128], index: 1, kind: input, shape index: {}]   ;;  %s356_s2 = inlined_call_operand.hbm [shape: f32[16,128], index: 2, kind: input, shape index: {}]   ;;  %s357_s3 = inlined_call_operand.hbm [shape: f32[1,1], index: 3, kind: output, shape index: {0}]   ;;  %s358_s4 = inlined_call_operand.hbm [shape: f32[1,1], index: 4, kind: output, shape index: {1}]  }
   0x1   :  { %12 = vsyncpa [#allocation7], 0 }
   0x2   :  { %13 = vsyncpa [#allocation5], 0 }
   0x3   :  { %14 = vsyncpa [#allocation10], 0  ;;  %s21_s17 = sshll.u32 %s355_s1, 4  ;;  %s296_s18 = smov [#allocation3]   ;;  %s22_s17 = int_to_ptr.hbm [resolvable:$true] %s21_s17 }
   0x4   :  { %s23_s19 = sshll.u32 %s296_s18, 4  ;;  %s34_s22 = sshll.u32 %s356_s2, 4  ;;  %s24_s19 = int_to_ptr.vmem [resolvable:$true] %s23_s19  ;;  %s35_s22 = int_to_ptr.hbm [resolvable:$true] %s34_s22 }
   0x5   :  { %s297_s23 = smov 128   ;;  %s298_s24 = smov 8  }
   0x6   :  { %29 = dma.hbm_to_vmem [thread:$0]  %s22_s17, 256, %s24_s19, [#allocation4], %s297_s23, %s297_s23, %s298_s24  }
   0x7   :  { %s299_s25 = smov [#allocation6]  }
   0x8   :  { %s36_s26 = sshll.u32 %s299_s25, 4  ;;  %s37_s26 = int_to_ptr.vmem [resolvable:$true] %s36_s26 }
   0x9   :  { %42 = dma.hbm_to_vmem [thread:$0]  %s35_s22, 256, %s37_s26, [#allocation7], %s297_s23, %s297_s23, %s298_s24  }
   0xa   :  { %288 = dma.done.wait [#allocation4], 256  }
   0xb   :  { %289 = vsyncadd [#allocation4], 4294967040 }
   0xc   :  { %290 = dma.done.wait [#allocation7], 256  }
   0xd   :  { %291 = vsyncadd [#allocation7], 4294967040  ;;  %v51_v0 = vld [vmem:[#allocation3] sm:$0xff]  ;;  %v52_v1 = vld [vmem:[#allocation3 + $0x8] sm:$0xff]  ;;  %vm73_vm0 = vcmask 0   ;;  %s300_s30 = smov [#allocation9]  }
   0xe   :  { %v53_v2 = vld [vmem:[#allocation6] sm:$0xff]  ;;  %v54_v3 = vld [vmem:[#allocation6 + $0x8] sm:$0xff]  ;;  %s156_s5 = sshll.u32 %s300_s30, 4  ;;  %s158_s8 = sshll.u32 %s358_s4, 4  ;;  %s157_s5 = int_to_ptr.vmem [resolvable:$true] %s156_s5  ;;  %s159_s8 = int_to_ptr.hbm [resolvable:$true] %s158_s8 }
   0xf   :  { %v55_v4 = vsub.f32 %v51_v0, %v53_v2  ;;  %v56_v5 = vsub.f32 %v52_v1, %v54_v3  ;;  %s301_s9 = smov [#allocation8]   ;;  %s147_s13 = sshll.u32 %s357_s3, 4  ;;  %s148_s13 = int_to_ptr.hbm [resolvable:$true] %s147_s13 }
  0x10   :  { %s145_s10 = sshll.u32 %s301_s9, 4  ;;  %s146_s10 = int_to_ptr.vmem [resolvable:$true] %s145_s10 }
  0x11   :  { %v333_v6 = vand.u32 2147483647, %v55_v4  ;;  %v335_v7 = vand.u32 2147483647, %v56_v5 }
  0x13   :  { %v59_v8 = vmax.f32 %v333_v6, %v335_v7 }
  0x15   :  { %60 = vmax.xlane.f32.xlu0 %v59_v8 }
  0x88   :  { %v61_v9 = vpop.xlane.xlu0 %60 }
  0x89   :  { %v62_v10 = vrot.slane %v61_v9, 4 }
  0x8b   :  { %v63_v11 = vmax.f32 %v61_v9, %v62_v10 }
  0x8d   :  { %v64_v12 = vrot.slane %v63_v11, 2 }
  0x8f   :  { %v65_v13 = vmax.f32 %v63_v11, %v64_v12 }
  0x91   :  { %v66_v14 = vrot.slane %v65_v13, 1 }
  0x93   :  { %v67_v15 = vmax.f32 %v65_v13, %v66_v14 }
  0x95   :  { %174 = vpush %v67_v15 }
  0xc6   :  { %s175_s1 = spop %174 }
  0xc7   :  { %s70_s28 = smax.f32 %s175_s1, %s354_s0 }
  0xc8   :  { %s71_s29 = smul.f32 1.4624753, %s70_s28 }
  0xca   :  { %v72_v16 = vstv %s71_s29 }
  0xcb   :  { %186 = vrcp.f32 %v72_v16  ;;  %74 = vst.msk [vmem:[#allocation9] sm:$0x1] %vm73_vm0, %v72_v16  ;;  %v87_v20 = vand.u32 2147483648, %v72_v16  ;;  %v85_v22 = vand.u32 2147483647, %v72_v16  ;;  %vm81_vm2 = vweird.f32 %v72_v16 }
  0xcc   :  { %161 = dma.vmem_to_hbm [thread:$0]  %s157_s5, 16, %s159_s8, [#allocation10]  }
  0xcd   :  { %v88_v24 = vor.u32 1.1754944e-38, %v87_v20  ;;  %vm86_vm4 = vcmp.eq.f32.partialorder %v85_v22, 8.507059e+37 }
  0xd1   :  { %v187_v17 = vpop.eup %186 }
  0xd2   :  { %v77_v18 = vmul.f32 %v187_v17, %v72_v16  ;;  %vm82_vm1 = vweird.f32 %v187_v17 }
  0xd3   :  { %vm83_vm3 = vmor %vm81_vm2, %vm82_vm1 }
  0xd4   :  { %v78_v19 = vsub.f32 1.0, %v77_v18 }
  0xd6   :  { %v79_v21 = vmul.f32 %v187_v17, %v78_v19 }
  0xd8   :  { %v80_v23 = vadd.f32 %v187_v17, %v79_v21 }
  0xda   :  { %v84_v25 = vsel %vm83_vm3, %v187_v17, %v80_v23 }
  0xdb   :  { %v89_v26 = vsel %vm86_vm4, %v88_v24, %v84_v25 }
  0xdc   :  { %176 = vpush %v89_v26 }
 0x10d   :  { %s177_s0 = spop %176 }
 0x10e   :  { %v91_v27 = vstv %s177_s0 }
 0x10f   :  { %v92_v28 = vmul.f32 %v91_v27, %v333_v6  ;;  %v93_v29 = vmul.f32 %v91_v27, %v335_v7 }
 0x111   :  { %v94_v30 = vsub.f32 1.0, %v92_v28  ;;  %v95_v31 = vsub.f32 1.0, %v93_v29 }
 0x113   :  { %188 = vrcp.f32 %v94_v30  ;;  %v107_v38 = vand.u32 2147483648, %v94_v30  ;;  %v105_v40 = vand.u32 2147483647, %v94_v30  ;;  %v121_v41 = vand.u32 2147483648, %v95_v31 }
 0x114   :  { %190 = vrcp.f32 %v95_v31  ;;  %v119_v43 = vand.u32 2147483647, %v95_v31  ;;  %vm101_vm7 = vweird.f32 %v94_v30  ;;  %vm115_vm9 = vweird.f32 %v95_v31 }
 0x115   :  { %v108_v45 = vor.u32 1.1754944e-38, %v107_v38  ;;  %vm106_vm10 = vcmp.eq.f32.partialorder %v105_v40, 8.507059e+37  ;;  %v122_v48 = vor.u32 1.1754944e-38, %v121_v41 }
 0x116   :  { %vm120_vm12 = vcmp.eq.f32.partialorder %v119_v43, 8.507059e+37 }
 0x119   :  { %v189_v32 = vpop.eup %188 }
 0x11a   :  { %v191_v33 = vpop.eup %190  ;;  %v97_v34 = vmul.f32 %v189_v32, %v94_v30  ;;  %vm102_vm5 = vweird.f32 %v189_v32 }
 0x11b   :  { %v111_v35 = vmul.f32 %v191_v33, %v95_v31  ;;  %vm116_vm6 = vweird.f32 %v191_v33  ;;  %vm103_vm8 = vmor %vm101_vm7, %vm102_vm5 }
 0x11c   :  { %v98_v36 = vsub.f32 1.0, %v97_v34  ;;  %vm117_vm11 = vmor %vm115_vm9, %vm116_vm6 }
 0x11d   :  { %v112_v37 = vsub.f32 1.0, %v111_v35 }
 0x11e   :  { %v99_v39 = vmul.f32 %v189_v32, %v98_v36 }
 0x11f   :  { %v113_v42 = vmul.f32 %v191_v33, %v112_v37 }
 0x120   :  { %v100_v44 = vadd.f32 %v189_v32, %v99_v39 }
 0x121   :  { %v114_v46 = vadd.f32 %v191_v33, %v113_v42 }
 0x122   :  { %v104_v47 = vsel %vm103_vm8, %v189_v32, %v100_v44 }
 0x123   :  { %v109_v49 = vsel %vm106_vm10, %v108_v45, %v104_v47  ;;  %v118_v50 = vsel %vm117_vm11, %v191_v33, %v114_v46 }
 0x124   :  { %v123_v51 = vsel %vm120_vm12, %v122_v48, %v118_v50  ;;  %v124_v52 = vmul.f32 %v109_v49, %v109_v49 }
 0x125   :  { %v125_v53 = vmul.f32 %v123_v51, %v123_v51 }
 0x126   :  { %v126_v54 = vmul.f32 %v124_v52, %v333_v6 }
 0x127   :  { %v127_v55 = vmul.f32 %v125_v53, %v335_v7 }
 0x129   :  { %v128_v56 = vadd.f32 %v127_v55, %v126_v54 }
 0x12b   :  { %129 = vadd.xlane.f32.xlu0 %v128_v56 }
 0x19e   :  { %v130_v57 = vpop.xlane.xlu0 %129 }
 0x19f   :  { %v131_v58 = vrot.slane %v130_v57, 4 }
 0x1a1   :  { %v132_v59 = vadd.f32 %v131_v58, %v130_v57 }
 0x1a3   :  { %v133_v60 = vrot.slane %v132_v59, 2 }
 0x1a5   :  { %v134_v61 = vadd.f32 %v133_v60, %v132_v59 }
 0x1a7   :  { %v135_v62 = vrot.slane %v134_v61, 1 }
 0x1a9   :  { %v136_v63 = vadd.f32 %v135_v62, %v134_v61 }
 0x1ab   :  { %178 = vpush %v136_v63 }
 0x1dc   :  { %s179_s14 = spop %178 }
 0x1dd   :  { %v138_v0 = vstv %s179_s14 }
 0x1de   :  { %139 = vst.msk [vmem:[#allocation8] sm:$0x1] %vm73_vm0, %v138_v0 }
 0x1df   :  { %150 = dma.vmem_to_hbm [thread:$0]  %s146_s10, 16, %s148_s13, [#allocation5]  }
 0x1e0   :  { %292 = dma.done.wait [#allocation5], 16  }
 0x1e1   :  { %293 = vsyncadd [#allocation5], 4294967280 }
 0x1e2   :  { %294 = dma.done.wait [#allocation10], 16  }
 0x1e3   :  { %295 = vsyncadd [#allocation10], 4294967280 }
 0x1e4   :  { %170 = vsyncpa [#allocation4], 1 }
 0x1e5   :  { %171 = vsyncpa [#allocation7], 1 }
 0x1e6   :  { %172 = vsyncpa [#allocation5], 1 }
 0x1e7   :  { %173 = vsyncpa [#allocation10], 1 }

</bundles_post_ra>
